<compile_context>
chip_gen: v7x
topology: tpu7x:2x2x1
jax: 0.10.0
libtpu: 0.0.40
codegen_flags: <defaults>
</compile_context>

<pallas_src>
import jax
import jax.numpy as jnp
from jax.experimental import pallas as pl
from jax.experimental.pallas import tpu as pltpu

HEAD_NUM = 2


def make_kernel(B, S, H, M):
    def attn_kernel(x_ref, w_ref, v_ref, o_ref):
        # x : (B*S, C+1)  cat([query, key, ones], -1), batch folded into rows
        # w : (H,  C+1)   [weight | bias] / inv_scale, natural (out, in) layout
        # v : (B*M, H)    value.reshape(-1, H), natural layout (no transpose)
        # o : (B*H, M)

        # scores^T[h, b*S+s] = sum_c w[h, c] * x[b*S+s, c]
        # Single MXU matmul; contracting axis 1 of both operands avoids any
        # wrapper-side transpose and yields the layout we want (h on sublanes).
        scores_t = jax.lax.dot_general(
            w_ref[...], x_ref[...], (((1,), (1,)), ((), ())),
            preferred_element_type=jnp.float32)                    # (H, B*S)

        # One in-kernel XLU transpose of value for the whole problem:
        # (B*M, H) -> (H, B*M); the XLU slot is otherwise idle here.
        v_t = v_ref[...].T                                         # (H, B*M)

        for b in range(B):  # B tiny & static: fully unrolled, static slices only
            st = scores_t[:, b * S:(b + 1) * S]                    # (H, S)
            # softmax over the S axis (last dim after the qk.T in torch)
            mx = jnp.max(st, axis=1, keepdims=True)
            ex = jnp.exp(st - mx)
            denom = jnp.sum(ex, axis=1, keepdims=True)
            # reciprocal-multiply instead of an elementwise divide (exact;
            # approx=True would move it to the EUP but may exceed 1e-5 rtol).
            p = ex * pl.reciprocal(denom, approx=False)            # (H, S)

            vt_b = v_t[:, b * M:(b + 1) * M]                       # (S, M)
            # out[b, h, m] = sum_s p[h, s] * vt_b[s, m]
            # S == 2 -> two VPU broadcast multiply-adds; no per-batch MXU push.
            ob = p[:, 0:1] * vt_b[0:1, :]
            for s in range(1, S):
                ob = ob + p[:, s:s + 1] * vt_b[s:s + 1, :]         # (H, M)
            o_ref[b * H:(b + 1) * H, :] = ob

    return attn_kernel


def model_forward(query, key, value, inv_scale, weight, bias, head_num=HEAD_NUM):
    B, S, Q = query.shape
    K = key.shape[-1]
    H = head_num
    # The module's reshape/transpose + final matmul only typecheck when
    # seq == head_num; guard it (otherwise the contraction is silently wrong).
    assert S == H, "module semantics require seq == head_num"
    assert (value.shape[1] * value.shape[2]) % H == 0
    M = (value.shape[1] * value.shape[2]) // H

    f32 = jnp.float32

    # Bias + 1/inv_scale folded into the score matmul (exact, the Linear is
    # affine): ones column on x, bias column on the natural-layout weight.
    x_aug = jnp.concatenate(
        [query.reshape(B * S, Q).astype(f32),
         key.reshape(B * S, K).astype(f32),
         jnp.ones((B * S, 1), dtype=f32)], axis=-1)                # (B*S, Q+K+1)

    inv = inv_scale.reshape(()).astype(f32)
    w_aug = (jnp.concatenate([weight.astype(f32),
                              bias.astype(f32)[:, None]], axis=-1) / inv)  # (H, Q+K+1)

    # value in its natural layout: pure contiguous reshape, no XLA transpose.
    v2 = value.reshape(B * M, H).astype(f32)                       # (B*M, H)

    out = pl.pallas_call(
        make_kernel(B, S, H, M),
        out_shape=jax.ShapeDtypeStruct((B * H, M), f32),
        # No grid: whole problem is a few KB -> one step, full VMEM blocks,
        # zero per-step pipeline overhead (also the right choice on v7x).
        in_specs=[pl.BlockSpec(memory_space=pltpu.MemorySpace.VMEM)] * 3,
        out_specs=pl.BlockSpec(memory_space=pltpu.MemorySpace.VMEM),
    )(x_aug, w_aug, v2)

    # (B*H, M) -> (B, H*M): contiguous row-major reshape, layout plumbing only.
    return out.reshape(B, H * M)


def ref_forward(query, key, value, inv_scale, weight, bias, head_num=HEAD_NUM):
    # Pure-JAX reference mirroring the PyTorch forward exactly.
    B = query.shape[0]
    qk = jnp.concatenate([query, key], axis=-1) @ weight.T + bias
    qk = qk.reshape(B, -1, head_num).swapaxes(-2, -1)
    soft = jax.nn.softmax(qk / inv_scale, axis=-1)
    vt = value.reshape(B, -1, head_num).swapaxes(-2, -1)
    out = jnp.matmul(soft, vt)
    return out.reshape(B, -1)


if __name__ == "__main__":
    # Small, self-consistent shapes: the module requires seq == head_num == 2.
    B, S, Q, K = 2, HEAD_NUM, 20, 12
    rng = jax.random.PRNGKey(0)
    k1, k2, k3, k4, k5, k6 = jax.random.split(rng, 6)

    query = jax.random.normal(k1, (B, S, Q), dtype=jnp.float32)
    key_t = jax.random.normal(k2, (B, S, K), dtype=jnp.float32)
    value = jax.random.normal(k3, (B, 5, 4), dtype=jnp.float32)   # value_size=5
    inv_scale = jax.random.normal(k4, (1,), dtype=jnp.float32)

    # Deterministic parameter init for nn.Linear(32, 2)
    weight = 0.1 * jax.random.normal(k5, (HEAD_NUM, Q + K), dtype=jnp.float32)
    bias = 0.1 * jax.random.normal(k6, (HEAD_NUM,), dtype=jnp.float32)

    out = model_forward(query, key_t, value, inv_scale, weight, bias)
    out = jax.block_until_ready(out)

    ref = ref_forward(query, key_t, value, inv_scale, weight, bias)
    assert out.shape == ref.shape
    assert jnp.allclose(out, ref, atol=1e-5, rtol=1e-5), (out, ref)

    print("KERNEL_OK")
</pallas_src>

<mosaic_0001>
module attributes {stable_mosaic.version = 11 : i64} {
  func.func @attn_kernel(%arg0: memref<4x33xf32, #tpu.memory_space<vmem>>, %arg1: memref<2x33xf32, #tpu.memory_space<vmem>>, %arg2: memref<20x2xf32, #tpu.memory_space<vmem>>, %arg3: memref<4x10xf32, #tpu.memory_space<vmem>>) attributes {dimension_semantics = [], scalar_prefetch = 0 : i64, scratch_operands = 0 : i64, tpu.core_type = #tpu.core_type<tc>} {
    %c0 = arith.constant 0 : index
    %c0_0 = arith.constant 0 : index
    %0 = vector.load %arg1[%c0, %c0_0] : memref<2x33xf32, #tpu.memory_space<vmem>>, vector<2x33xf32>
    %c0_1 = arith.constant 0 : index
    %c0_2 = arith.constant 0 : index
    %1 = vector.load %arg0[%c0_1, %c0_2] : memref<4x33xf32, #tpu.memory_space<vmem>>, vector<4x33xf32>
    %cst = arith.constant dense<0.000000e+00> : vector<2x4xf32>
    %2 = tpu.matmul %0, %1, %cst {dimension_numbers = #tpu.dot_dimension_numbers<[1], [1], [0], [0], [0, 0, 1, 0], [], []>} : vector<2x33xf32>, vector<4x33xf32>, vector<2x4xf32> -> vector<2x4xf32>
    %c0_3 = arith.constant 0 : index
    %c0_4 = arith.constant 0 : index
    %3 = vector.load %arg2[%c0_3, %c0_4] : memref<20x2xf32, #tpu.memory_space<vmem>>, vector<20x2xf32>
    %4 = tpu.transpose %3, [1, 0] : vector<20x2xf32> -> vector<2x20xf32>
    %5 = vector.extract_strided_slice %2 {offsets = [0, 0], sizes = [2, 2], strides = [1, 1]} : vector<2x4xf32> to vector<2x2xf32>
    %cst_5 = arith.constant dense<0xFF800000> : vector<2xf32>
    %6 = vector.multi_reduction <maximumf>, %5, %cst_5 [1] : vector<2x2xf32> to vector<2xf32>
    %7 = vector.shape_cast %6 : vector<2xf32> to vector<2x1xf32>
    %8 = vector.broadcast %7 : vector<2x1xf32> to vector<2x2xf32>
    %9 = arith.subf %5, %8 : vector<2x2xf32>
    %10 = math.exp %9 : vector<2x2xf32>
    %cst_6 = arith.constant dense<0.000000e+00> : vector<2xf32>
    %11 = vector.multi_reduction <add>, %10, %cst_6 [1] : vector<2x2xf32> to vector<2xf32>
    %12 = vector.shape_cast %11 : vector<2xf32> to vector<2x1xf32>
    %13 = tpu.reciprocal %12 : vector<2x1xf32> -> vector<2x1xf32>
    %14 = vector.broadcast %13 : vector<2x1xf32> to vector<2x2xf32>
    %15 = arith.mulf %10, %14 : vector<2x2xf32>
    %16 = vector.extract_strided_slice %4 {offsets = [0, 0], sizes = [2, 10], strides = [1, 1]} : vector<2x20xf32> to vector<2x10xf32>
    %17 = vector.extract_strided_slice %15 {offsets = [0, 0], sizes = [2, 1], strides = [1, 1]} : vector<2x2xf32> to vector<2x1xf32>
    %18 = vector.extract_strided_slice %16 {offsets = [0, 0], sizes = [1, 10], strides = [1, 1]} : vector<2x10xf32> to vector<1x10xf32>
    %19 = vector.broadcast %17 : vector<2x1xf32> to vector<2x10xf32>
    %20 = vector.broadcast %18 : vector<1x10xf32> to vector<2x10xf32>
    %21 = arith.mulf %19, %20 : vector<2x10xf32>
    %22 = vector.extract_strided_slice %15 {offsets = [0, 1], sizes = [2, 1], strides = [1, 1]} : vector<2x2xf32> to vector<2x1xf32>
    %23 = vector.extract_strided_slice %16 {offsets = [1, 0], sizes = [1, 10], strides = [1, 1]} : vector<2x10xf32> to vector<1x10xf32>
    %24 = vector.broadcast %22 : vector<2x1xf32> to vector<2x10xf32>
    %25 = vector.broadcast %23 : vector<1x10xf32> to vector<2x10xf32>
    %26 = arith.mulf %24, %25 : vector<2x10xf32>
    %27 = arith.addf %21, %26 : vector<2x10xf32>
    %c0_7 = arith.constant 0 : index
    %c0_8 = arith.constant 0 : index
    %28 = vector.load %arg3[%c0_7, %c0_8] : memref<4x10xf32, #tpu.memory_space<vmem>>, vector<2x10xf32>
    tpu.vector_store %arg3[%c0_7, %c0_8], %27 {strides = array<i32>} : memref<4x10xf32, #tpu.memory_space<vmem>>, vector<2x10xf32>,
    %29 = vector.extract_strided_slice %2 {offsets = [0, 2], sizes = [2, 2], strides = [1, 1]} : vector<2x4xf32> to vector<2x2xf32>
    %cst_9 = arith.constant dense<0xFF800000> : vector<2xf32>
    %30 = vector.multi_reduction <maximumf>, %29, %cst_9 [1] : vector<2x2xf32> to vector<2xf32>
    %31 = vector.shape_cast %30 : vector<2xf32> to vector<2x1xf32>
    %32 = vector.broadcast %31 : vector<2x1xf32> to vector<2x2xf32>
    %33 = arith.subf %29, %32 : vector<2x2xf32>
    %34 = math.exp %33 : vector<2x2xf32>
    %cst_10 = arith.constant dense<0.000000e+00> : vector<2xf32>
    %35 = vector.multi_reduction <add>, %34, %cst_10 [1] : vector<2x2xf32> to vector<2xf32>
    %36 = vector.shape_cast %35 : vector<2xf32> to vector<2x1xf32>
    %37 = tpu.reciprocal %36 : vector<2x1xf32> -> vector<2x1xf32>
    %38 = vector.broadcast %37 : vector<2x1xf32> to vector<2x2xf32>
    %39 = arith.mulf %34, %38 : vector<2x2xf32>
    %40 = vector.extract_strided_slice %4 {offsets = [0, 10], sizes = [2, 10], strides = [1, 1]} : vector<2x20xf32> to vector<2x10xf32>
    %41 = vector.extract_strided_slice %39 {offsets = [0, 0], sizes = [2, 1], strides = [1, 1]} : vector<2x2xf32> to vector<2x1xf32>
    %42 = vector.extract_strided_slice %40 {offsets = [0, 0], sizes = [1, 10], strides = [1, 1]} : vector<2x10xf32> to vector<1x10xf32>
    %43 = vector.broadcast %41 : vector<2x1xf32> to vector<2x10xf32>
    %44 = vector.broadcast %42 : vector<1x10xf32> to vector<2x10xf32>
    %45 = arith.mulf %43, %44 : vector<2x10xf32>
    %46 = vector.extract_strided_slice %39 {offsets = [0, 1], sizes = [2, 1], strides = [1, 1]} : vector<2x2xf32> to vector<2x1xf32>
    %47 = vector.extract_strided_slice %40 {offsets = [1, 0], sizes = [1, 10], strides = [1, 1]} : vector<2x10xf32> to vector<1x10xf32>
    %48 = vector.broadcast %46 : vector<2x1xf32> to vector<2x10xf32>
    %49 = vector.broadcast %47 : vector<1x10xf32> to vector<2x10xf32>
    %50 = arith.mulf %48, %49 : vector<2x10xf32>
    %51 = arith.addf %45, %50 : vector<2x10xf32>
    %c2 = arith.constant 2 : index
    %c0_11 = arith.constant 0 : index
    %52 = vector.load %arg3[%c2, %c0_11] : memref<4x10xf32, #tpu.memory_space<vmem>>, vector<2x10xf32>
    tpu.vector_store %arg3[%c2, %c0_11], %51 {strides = array<i32>} : memref<4x10xf32, #tpu.memory_space<vmem>>, vector<2x10xf32>,
    return
  }
}

</mosaic_0001>

<bundles_post_ra>
// kernel: tpu_custom_call.1
= control target key start
LH: loop header
LB: loop body
LE: loop exit
PB: predicated region body
PF: predicated region fallthrough
CT: control target
= control target key end

     0   :  { %vm17_vm0 = vcmask 269312   ;;  %v265_v1 = vmov 0.0   ;;  %vm266_vm1 = vmmov 0   ;;  %s324_s0 = inlined_call_operand.vmem [shape: f32[4,33], index: 0, kind: input, shape index: {}]   ;;  %s325_s1 = inlined_call_operand.vmem [shape: f32[2,33], index: 1, kind: input, shape index: {}]   ;;  %s326_s2 = inlined_call_operand.vmem [shape: f32[20,2], index: 2, kind: input, shape index: {}]   ;;  %s327_s3 = inlined_call_operand.hbm [shape: f32[4,10], index: 3, kind: output, shape index: {}]  }
   0x1   :  { %v16_v0 = vld [vmem:[%s324_s0] sm:$0xf]  ;;  %214 = vmatprep.subr.mxu0 %v265_v1  ;;  %216 = vmatprep.mubr.msk.f32.mxu0 %vm266_vm1, %v265_v1 }
   0x2   :  { %8 = vsyncpa [#allocation3], 0  ;;  %215 = vmatpush3.xpose.msk.msra.mxu0 %vm17_vm0, %v16_v0  ;;  %v15_v2 = vld [vmem:[%s325_s1] sm:$0x3]  ;;  %vm163_vm2 = vcmask 25616   ;;  %vm129_vm3 = vcmask 9216   ;;  %v146_v31 = vlaneseq }
   0x3   :  { %s267_s0 = smov 126   ;;  %v268_v18 = vmov 3   ;;  %v269_v19 = vmov 2   ;;  %v270_v26 = vmov 0   ;;  %v271_v27 = vmov 1   ;;  %v94_v28 = vld [vmem:[%s326_s2] sm:$0xff] }
   0x4   :  { %229 = vset.pattern.permute.xlu0 %v268_v18  ;;  %228 = vset.pattern.permute.xlu1 %v269_v19  ;;  %v95_v29 = vld [vmem:[%s326_s2 + $0x8] sm:$0xff]  ;;  %v96_v30 = vld [vmem:[%s326_s2 + $0x10] sm:$0xf]  ;;  %v147_v33 = vshrl.u32 %v146_v31, 7  ;;  %vm161_vm4 = vcmask 74752   ;;  %s272_s2 = smov 118  }
   0x5   :  { %217 = vmatmul.mubr.msk.f32.vlgmr.msra.gmra.mrb[0].mxu0 %vm17_vm0, %v15_v2  ;;  %s273_s21 = smov [#allocation2]  }
   0x6   :  { %v148_v36 = vsub.s32 0, %v147_v33  ;;  %v157_v37 = vsub.s32 1, %v147_v33  ;;  %s202_s22 = sshll.u32 %s273_s21, 4  ;;  %s203_s22 = int_to_ptr.vmem [resolvable:$true] %s202_s22 }
   0x7   :  { %s241_s23 = scalar_lea.vmem %s203_s22, 64  ;;  %p246_p1 = scmp.lt.s32.totalorder %s203_s22, %s203_s22 }
   0x8   :  { %p242_p0 = scmp.ne.s32.totalorder %s203_s22, %s241_s23  ;;  %p247_p2 = scmp.lt.s32.totalorder %s241_s23, %s241_s23 }
   0xa   :  { %p248_p3 = por %p247_p2, %p246_p1 }
   0xc   :  { %p249_p4 = pnand %p248_p3, %p242_p0 }
  0xd8   :  { %v90_v3 = vpop.f32.mrb[0].mxu0 }
  0xd9   :  { %v218_v4 = vpop.f32.mrb[1].mxu0  ;;  %v164_v5 = vsel %vm163_vm2, %v90_v3, -inf  ;;  %v130_v6 = vsel %vm129_vm3, %v90_v3, -inf }
  0xda   :  { %165 = vmax.xlane.f32.xlu0 %v164_v5  ;;  %131 = vmax.xlane.f32.xlu1 %v130_v6 }
 0x167   :  { %v166_v7 = vpop.xlane.xlu0 %165  ;;  %v132_v11 = vpop.xlane.xlu1 %131 }
 0x168   :  { %v167_v8 = vsub.f32 %v90_v3, %v166_v7  ;;  %v133_v12 = vsub.f32 %v90_v3, %v132_v11 }
 0x16a   :  { %v168_v9 = vmul.f32 1.442695, %v167_v8  ;;  %v134_v13 = vmul.f32 1.442695, %v133_v12 }
 0x16c   :  { %233 = vpow2.f32 %v168_v9 }
 0x16d   :  { %235 = vpow2.f32 %v134_v13 }
 0x176   :  { %v234_v10 = vpop.eup %233 }
 0x177   :  { %171 = vrot.lane.b32.xlu0 %v234_v10, %s267_s0  ;;  %v236_v16 = vpop.eup %235 }
 0x178   :  { %v136_v17 = vsel %vm129_vm3, %v236_v16, 0.0 }
 0x1e9   :  { %v172_v14 = vpop.permute.xlu0 %171 }
 0x1ea   :  { %v174_v15 = vsel %vm129_vm3, %v172_v14, 0.0 }
 0x1eb   :  { %175 = vadd.xlane.f32.xlu1 %v174_v15 }
 0x1ef   :  { %137 = vadd.xlane.f32.xlu1 %v136_v17 }
 0x278   :  { %v176_v20 = vpop.xlane.xlu1 %175 }
 0x279   :  { %237 = vrcp.f32 %v176_v20 }
 0x27c   :  { %v138_v21 = vpop.xlane.xlu1 %137 }
 0x27d   :  { %239 = vrcp.f32 %v138_v21 }
 0x283   :  { %v238_v22 = vpop.eup %237 }
 0x284   :  { %v178_v23 = vmul.f32 %v238_v22, %v234_v10 }
 0x286   :  { %186 = vperm.xlu0 %229, %v178_v23   ;;  %181 = vperm.xlu1 %228, %v178_v23  }
 0x287   :  { %v240_v24 = vpop.eup %239 }
 0x288   :  { %v140_v25 = vmul.f32 %v240_v24, %v236_v16 }
 0x28a   :  { %230 = vset.pattern.permute.xlu0 %v270_v26 }
 0x28b   :  { %143 = vperm.xlu0 %230, %v140_v25  }
 0x28f   :  { %231 = vset.pattern.permute.xlu0 %v271_v27 }
 0x290   :  { %152 = vperm.xlu0 %231, %v140_v25  }
 0x294   :  { %232 = vset.pattern.permute.xlu0 %v268_v18 }
 0x2af   :  { %97 = vxpose.xlu1.b32.start [1/3] (short) (narrow) %v94_v28, 8 }
 0x2b3   :  { %98 = vxpose.xlu1.b32.cont [2/3] (short) (narrow) %v95_v29, 8 }
 0x2b7   :  { %99 = vxpose.xlu1.b32.end [3/3] (short) (narrow) %v96_v30, 8 }
 0x305   :  { %v187_v32 = vpop.permute.xlu0 %186  ;;  %v182_v34 = vpop.permute.xlu1 %181 }
 0x30a   :  { %v144_v35 = vpop.permute.xlu0 %143 }
 0x30f   :  { %v153_v41 = vpop.permute.xlu0 %152 }
 0x32f   :  { %v113_v38 = vpop.trf.xlu1 }
 0x330   :  { %v149_v39 = vrot.slane %v113_v38, %v148_v36  ;;  %v158_v40 = vrot.slane %v113_v38, %v157_v37 }
 0x332   :  { %v150_v42 = vmul.f32 %v149_v39, %v144_v35  ;;  %v159_v43 = vmul.f32 %v158_v40, %v153_v41  ;;  %v184_v44 = vmul.f32 %v182_v34, %v149_v39  ;;  %v189_v45 = vmul.f32 %v187_v32, %v158_v40 }
 0x334   :  { %v190_v46 = vadd.f32 %v189_v45, %v184_v44  ;;  %v160_v47 = vadd.f32 %v159_v43, %v150_v42 }
 0x336   :  { %192 = vrot.lane.b32.xlu0 %v190_v46, %s272_s2  ;;  %162 = vst.msk [vmem:[#allocation2] sm:$0x3] %vm161_vm4, %v160_v47 }
 0x3a8   :  { %v193_v48 = vpop.permute.xlu0 %192 }
 0x3a9   :  { %195 = vst.msk [vmem:[#allocation2 + $0x2] sm:$0x3] %vm161_vm4, %v193_v48 }
 0x3aa   :  { %252 = shalt.err (!%p249_p4)
}
 0x3ab   :  { %s253_s26 = scalar_lea.hbm %s327_s3, 64 }
 0x3ac   :  { %p254_p5 = scmp.ne.s32.totalorder %s327_s3, %s253_s26  ;;  %p257_p6 = scmp.lt.u32.totalorder %s253_s26, %s327_s3 }
 0x3ae   :  { %p259_p7 = pnand %p257_p6, %p254_p5 }
 0x3b0   :  { %262 = shalt.err (!%p259_p7)
}
 0x3b1   :  { %205 = dma.vmem_to_hbm [thread:$0]  %s203_s22, 64, %s327_s3, [#allocation3]  }
 0x3b2   :  { %263 = dma.done.wait [#allocation3], 64  }
 0x3b3   :  { %264 = vsyncadd [#allocation3], 4294967232 }
 0x3b4   :  { %209 = vsyncpa [#allocation3], 1 }

</bundles_post_ra>
